<compile_context>
chip_gen: v7x
topology: tpu7x:2x2x1
jax: 0.10.0
libtpu: 0.0.40
codegen_flags: <defaults>
</compile_context>

<pallas_src>
import functools

import jax
import jax.numpy as jnp
from jax.experimental import pallas as pl
from jax.experimental.pallas import tpu as pltpu


def _round_up(x, m):
    return (x + m - 1) // m * m


def _choose_tile(n_rows, d_pad, budget_bytes=24 * 1024 * 1024):
    """Rows per grid step; keep VMEM footprint (scratch + double-buffered
    outputs) under ~24 MiB so it also fits v7x's smaller VMEM."""
    per_row_bytes = (3 * 2 * d_pad      # 3 gather buffers of width 2*d_pad
                     + 2 * 2 * d_pad    # 2 double-buffered (TB, d_pad) outputs
                     + 4) * 4           # score (double-buffered)
    tb = budget_bytes // max(per_row_bytes, 1)
    tb = max(8, min(512, (tb // 8) * 8))        # multiple of 8 sublanes
    tb = min(tb, _round_up(max(n_rows, 1), 8))  # don't over-pad tiny batches
    return int(tb)


def _split_chunks(tb):
    """Split a tile into sub-chunks for the in-tile gather/compute pipeline.
    Chunk size must stay a multiple of 8 (sublane-aligned stores)."""
    for nc in (8, 4, 2, 1):
        cs = tb // nc
        if tb % nc == 0 and cs % 8 == 0:
            return nc, cs
    return 1, tb


def _transd_gather_kernel(tb, d_pad, n_chunks, chunk, l1_flag,
                          # scalar prefetch (SMEM)
                          h_idx_ref, t_idx_ref, r_idx_ref,
                          # HBM-resident combined embedding tables (pl.ANY)
                          ent_tbl_ref, rel_tbl_ref,
                          # outputs (VMEM, blocked over the batch)
                          score_ref, h_out_ref, t_out_ref,
                          # scratch
                          h_buf, t_buf, r_buf, sem):
    """Gather + TransD same-size projection + translation score, one tile."""
    i = pl.program_id(0)
    base = i * tb

    def issue_chunk(c):
        @pl.loop(0, chunk)
        def _(j):
            dst = c * chunk + j
            row = base + dst
            pltpu.make_async_copy(
                ent_tbl_ref.at[pl.ds(h_idx_ref[row], 1), :],
                h_buf.at[pl.ds(dst, 1), :], sem.at[0, c]).start()
            pltpu.make_async_copy(
                ent_tbl_ref.at[pl.ds(t_idx_ref[row], 1), :],
                t_buf.at[pl.ds(dst, 1), :], sem.at[1, c]).start()
            pltpu.make_async_copy(
                rel_tbl_ref.at[pl.ds(r_idx_ref[row], 1), :],
                r_buf.at[pl.ds(dst, 1), :], sem.at[2, c]).start()

    def wait_chunk(c):
        # Wait descriptors match the per-row copy shape; fixed source row so
        # no SMEM index reads happen after DMA waits, real dst row for deps.
        @pl.loop(0, chunk)
        def _(j):
            dst = c * chunk + j
            pltpu.make_async_copy(
                ent_tbl_ref.at[pl.ds(0, 1), :],
                h_buf.at[pl.ds(dst, 1), :], sem.at[0, c]).wait()
            pltpu.make_async_copy(
                ent_tbl_ref.at[pl.ds(0, 1), :],
                t_buf.at[pl.ds(dst, 1), :], sem.at[1, c]).wait()
            pltpu.make_async_copy(
                rel_tbl_ref.at[pl.ds(0, 1), :],
                r_buf.at[pl.ds(dst, 1), :], sem.at[2, c]).wait()

    # Prime the pipeline with chunk 0's gathers, then per chunk: issue the
    # next chunk's DMAs, wait the current chunk, compute + store it while the
    # next chunk's DMAs are in flight.
    issue_chunk(0)
    for c in range(n_chunks):
        if c + 1 < n_chunks:
            issue_chunk(c + 1)
        wait_chunk(c)

        lo = c * chunk
        hi = lo + chunk
        # Combined rows: [:d_pad] = embedding, [d_pad:] = projection vector.
        h_e = h_buf[lo:hi, :d_pad]
        h_p = h_buf[lo:hi, d_pad:]
        t_e = t_buf[lo:hi, :d_pad]
        t_p = t_buf[lo:hi, d_pad:]
        r_e = r_buf[lo:hi, :d_pad]
        r_p = r_buf[lo:hi, d_pad:]

        # projection_transD_pytorch_samesize(e, ep, rp)
        #   = e + sum(e * ep, dim=1, keepdim=True) * rp
        h_dot = jnp.sum(h_e * h_p, axis=1, keepdims=True)       # (cs, 1)
        t_dot = jnp.sum(t_e * t_p, axis=1, keepdims=True)       # (cs, 1)
        h_proj = h_e + h_dot * r_p                                # (cs, D_pad)
        t_proj = t_e + t_dot * r_p                                # (cs, D_pad)

        diff = h_proj + r_e - t_proj
        if l1_flag:
            score = jnp.sum(jnp.abs(diff), axis=1, keepdims=True)   # (cs, 1)
        else:
            score = jnp.sum(diff * diff, axis=1, keepdims=True)     # (cs, 1)

        score_ref[lo:hi, :] = score
        h_out_ref[lo:hi, :] = h_proj
        t_out_ref[lo:hi, :] = t_proj


@functools.partial(jax.jit, static_argnames=("d", "l1_flag"))
def transd_forward_fused(ent_table, rel_table, h_idx, t_idx, r_idx,
                         *, d, l1_flag):
    """Fused gather + projection + score over a flat batch of triples.

    ent_table: (entity_total, 2*D_pad) [embedding | projection]
    rel_table: (relation_total, 2*D_pad) [embedding | projection]
    Returns (score (N,), h_proj (N, d), t_proj (N, d)).
    """
    n = h_idx.shape[0]
    d_pad = ent_table.shape[1] // 2
    tb = _choose_tile(n, d_pad)
    n_chunks, chunk = _split_chunks(tb)
    n_pad = _round_up(n, tb)
    num_tiles = n_pad // tb

    pad = n_pad - n
    if pad:
        zeros = jnp.zeros((pad,), jnp.int32)
        h_idx = jnp.concatenate([h_idx, zeros])
        t_idx = jnp.concatenate([t_idx, zeros])
        r_idx = jnp.concatenate([r_idx, zeros])

    kernel = functools.partial(
        _transd_gather_kernel, tb, d_pad, n_chunks, chunk, l1_flag)

    proj_spec = pl.BlockSpec((tb, d_pad), lambda i, hh, tt, rr: (i, 0))
    score_spec = pl.BlockSpec((tb, 1), lambda i, hh, tt, rr: (i, 0))

    grid_spec = pltpu.PrefetchScalarGridSpec(
        num_scalar_prefetch=3,
        grid=(num_tiles,),
        in_specs=[pl.BlockSpec(memory_space=pl.ANY),   # ent_table (HBM)
                  pl.BlockSpec(memory_space=pl.ANY)],  # rel_table (HBM)
        out_specs=(score_spec, proj_spec, proj_spec),
        scratch_shapes=[
            pltpu.VMEM((tb, 2 * d_pad), jnp.float32),  # h rows
            pltpu.VMEM((tb, 2 * d_pad), jnp.float32),  # t rows
            pltpu.VMEM((tb, 2 * d_pad), jnp.float32),  # r rows
            pltpu.SemaphoreType.DMA((3, n_chunks)),
        ])

    score, h_proj, t_proj = pl.pallas_call(
        kernel,
        out_shape=(jax.ShapeDtypeStruct((n_pad, 1), jnp.float32),
                   jax.ShapeDtypeStruct((n_pad, d_pad), jnp.float32),
                   jax.ShapeDtypeStruct((n_pad, d_pad), jnp.float32)),
        grid_spec=grid_spec,
        compiler_params=pltpu.CompilerParams(
            dimension_semantics=("parallel",)),
    )(h_idx, t_idx, r_idx, ent_table, rel_table)

    return score[:n, 0], h_proj[:n, :d], t_proj[:n, :d]


class TransDPretrainModelSameSizeJAX:
    """JAX/Pallas re-implementation of the PyTorch module's forward pass."""

    def __init__(self, entity_total, relation_total, embedding_size,
                 l1_flag=True, key=None):
        if key is None:
            key = jax.random.PRNGKey(0)
        self.entity_total = entity_total
        self.relation_total = relation_total
        self.embedding_size = embedding_size
        self.l1_flag = l1_flag
        self.d_pad = _round_up(embedding_size, 128)

        k_ent, k_rel = jax.random.split(key)
        bound = 6.0 / float(embedding_size) ** 0.5
        # Stand-in for the pretrained TransE weights (deterministic synthetic
        # init, row-normalized with a safe divide).
        ent_w = jax.random.uniform(k_ent, (entity_total, embedding_size),
                                   jnp.float32, -bound, bound)
        rel_w = jax.random.uniform(k_rel, (relation_total, embedding_size),
                                   jnp.float32, -bound, bound)
        ent_w = ent_w / jnp.maximum(
            jnp.linalg.norm(ent_w, axis=1, keepdims=True), 1e-12)
        rel_w = rel_w / jnp.maximum(
            jnp.linalg.norm(rel_w, axis=1, keepdims=True), 1e-12)

        def pad_d(w):
            return jnp.pad(w, ((0, 0), (0, self.d_pad - embedding_size)))

        # Combined tables: [embedding | projection], projection zero-init
        # (matches the PyTorch __init__).  One gather row fetches both halves.
        self.ent_table = jnp.concatenate(
            [pad_d(ent_w), jnp.zeros((entity_total, self.d_pad), jnp.float32)],
            axis=1)
        self.rel_table = jnp.concatenate(
            [pad_d(rel_w), jnp.zeros((relation_total, self.d_pad), jnp.float32)],
            axis=1)

    # Plain-jnp views (used by the reference implementation).
    @property
    def ent_embeddings(self):
        return self.ent_table[:, :self.embedding_size]

    @property
    def rel_embeddings(self):
        return self.rel_table[:, :self.embedding_size]

    @property
    def ent_proj_embeddings(self):
        return self.ent_table[:, self.d_pad:self.d_pad + self.embedding_size]

    @property
    def rel_proj_embeddings(self):
        return self.rel_table[:, self.d_pad:self.d_pad + self.embedding_size]

    def forward(self, pos_h, pos_t, pos_r, neg_h, neg_t, neg_r):
        b = pos_h.shape[0]
        # Fuse pos and neg into a single pallas_call (one flat batch).
        h_idx = jnp.concatenate([pos_h, neg_h]).astype(jnp.int32)
        t_idx = jnp.concatenate([pos_t, neg_t]).astype(jnp.int32)
        r_idx = jnp.concatenate([pos_r, neg_r]).astype(jnp.int32)

        score, h_proj, t_proj = transd_forward_fused(
            self.ent_table, self.rel_table, h_idx, t_idx, r_idx,
            d=self.embedding_size, l1_flag=self.l1_flag)

        pos = score[:b]
        neg = score[b:]
        return (pos, neg, h_proj[:b], t_proj[:b], h_proj[b:], t_proj[b:])


def _reference_forward(model, pos_h, pos_t, pos_r, neg_h, neg_t, neg_r):
    """Pure-jnp reference mirroring the PyTorch forward."""
    ent = model.ent_embeddings
    rel = model.rel_embeddings
    ent_p = model.ent_proj_embeddings
    rel_p = model.rel_proj_embeddings

    def proj(e, ep, rp):
        return e + jnp.sum(e * ep, axis=1, keepdims=True) * rp

    def side(h, t, r):
        h_e, t_e, r_e = ent[h], ent[t], rel[r]
        h_pp = proj(h_e, ent_p[h], rel_p[r])
        t_pp = proj(t_e, ent_p[t], rel_p[r])
        d = h_pp + r_e - t_pp
        s = jnp.sum(jnp.abs(d), 1) if model.l1_flag else jnp.sum(d * d, 1)
        return s, h_pp, t_pp

    p, ph, pt = side(pos_h, pos_t, pos_r)
    n, nh, nt = side(neg_h, neg_t, neg_r)
    return p, n, ph, pt, nh, nt


if __name__ == "__main__":
    # Small, deterministic example shapes.
    entity_total = 50
    relation_total = 20
    embedding_size = 32
    batch = 8

    model = TransDPretrainModelSameSizeJAX(
        entity_total, relation_total, embedding_size,
        l1_flag=True, key=jax.random.PRNGKey(0))

    # The original module zero-inits the projection embeddings (projection is
    # then the identity).  Perturb them here only so the correctness check
    # actually exercises the projection dot-product path.
    kp1, kp2 = jax.random.split(jax.random.PRNGKey(1))
    ent_proj = 0.1 * jax.random.normal(
        kp1, (entity_total, embedding_size), jnp.float32)
    rel_proj = 0.1 * jax.random.normal(
        kp2, (relation_total, embedding_size), jnp.float32)
    model.ent_table = model.ent_table.at[
        :, model.d_pad:model.d_pad + embedding_size].set(ent_proj)
    model.rel_table = model.rel_table.at[
        :, model.d_pad:model.d_pad + embedding_size].set(rel_proj)

    key = jax.random.PRNGKey(0)
    k1, k2, k3, k4, k5, k6 = jax.random.split(key, 6)
    pos_h = jax.random.randint(k1, (batch,), 0, entity_total, jnp.int32)
    pos_t = jax.random.randint(k2, (batch,), 0, entity_total, jnp.int32)
    pos_r = jax.random.randint(k3, (batch,), 0, relation_total, jnp.int32)
    neg_h = jax.random.randint(k4, (batch,), 0, entity_total, jnp.int32)
    neg_t = jax.random.randint(k5, (batch,), 0, entity_total, jnp.int32)
    neg_r = jax.random.randint(k6, (batch,), 0, relation_total, jnp.int32)

    ok = True
    for l1_flag in (True, False):      # exercise both L1 and L2 branches
        model.l1_flag = l1_flag
        outs = model.forward(pos_h, pos_t, pos_r, neg_h, neg_t, neg_r)
        outs = jax.block_until_ready(outs)
        refs = _reference_forward(model, pos_h, pos_t, pos_r,
                                  neg_h, neg_t, neg_r)
        for o, r in zip(outs, refs):
            assert o.shape == r.shape, (o.shape, r.shape)
            if not bool(jnp.allclose(o, r, atol=1e-4, rtol=1e-4)):
                ok = False

    if ok:
        print("KERNEL_OK")
    else:
        print("KERNEL_MISMATCH")
</pallas_src>

<mosaic_0001>
module attributes {stable_mosaic.version = 11 : i64} {
  func.func @_transd_gather_kernel(%arg0: i32, %arg1: memref<16xi32, #tpu.memory_space<smem>>, %arg2: memref<16xi32, #tpu.memory_space<smem>>, %arg3: memref<16xi32, #tpu.memory_space<smem>>, %arg4: memref<50x256xf32, #tpu.memory_space<any>>, %arg5: memref<20x256xf32, #tpu.memory_space<any>>, %arg6: memref<16x1xf32, #tpu.memory_space<vmem>>, %arg7: memref<16x128xf32, #tpu.memory_space<vmem>>, %arg8: memref<16x128xf32, #tpu.memory_space<vmem>>, %arg9: memref<16x256xf32, #tpu.memory_space<vmem>>, %arg10: memref<16x256xf32, #tpu.memory_space<vmem>>, %arg11: memref<16x256xf32, #tpu.memory_space<vmem>>, %arg12: memref<3x2x!tpu.dma_semaphore, #tpu.memory_space<semaphore_mem>>) attributes {dimension_semantics = [#tpu.dimension_semantics<parallel>], iteration_bounds = array<i64: 1>, scalar_prefetch = 3 : i64, scratch_operands = 4 : i64, tpu.core_type = #tpu.core_type<tc>, window_params = [{}, {}, {transform_indices = @transform_2, window_bounds = array<i64: 16, 1>}, {transform_indices = @transform_3, window_bounds = array<i64: 16, 128>}, {transform_indices = @transform_4, window_bounds = array<i64: 16, 128>}]} {
    %c16_i32 = arith.constant 16 : i32
    %0 = arith.muli %arg0, %c16_i32 : i32
    %c0_i32 = arith.constant 0 : i32
    %c8_i32 = arith.constant 8 : i32
    %1 = arith.addi %c0_i32, %c8_i32 : i32
    %c1_i32 = arith.constant 1 : i32
    scf.for %arg13 = %c0_i32 to %1 step %c1_i32  : i32 {
      %c1_i32_51 = arith.constant 1 : i32
      %57 = arith.muli %arg13, %c1_i32_51 : i32
      %c0_i32_52 = arith.constant 0 : i32
      %58 = arith.addi %c0_i32_52, %57 : i32
      %c0_i32_53 = arith.constant 0 : i32
      %59 = arith.addi %c0_i32_53, %58 : i32
      %60 = arith.addi %0, %59 : i32
      %61 = arith.index_cast %60 : i32 to index
      %62 = memref.load %arg1[%61] : memref<16xi32, #tpu.memory_space<smem>>
      %c0_i32_54 = arith.constant 0 : i32
      %c0_i32_55 = arith.constant 0 : i32
      %c0_i32_56 = arith.constant 0 : i32
      %63 = tpu.memref_slice %arg4[%62, %c0_i32_56] : memref<50x256xf32, #tpu.memory_space<any>> -> memref<1x256xf32, #tpu.memory_space<any>>
      %c0_i32_57 = arith.constant 0 : i32
      %64 = tpu.memref_slice %arg9[%59, %c0_i32_57] : memref<16x256xf32, #tpu.memory_space<vmem>> -> memref<1x256xf32, #tpu.memory_space<vmem>>
      %65 = tpu.memref_slice %arg12[%c0_i32_54, %c0_i32_55] : memref<3x2x!tpu.dma_semaphore, #tpu.memory_space<semaphore_mem>> -> memref<1x1x!tpu.dma_semaphore, #tpu.memory_space<semaphore_mem>>
      %66 = tpu.memref_squeeze %65 : memref<1x1x!tpu.dma_semaphore, #tpu.memory_space<semaphore_mem>> -> memref<!tpu.dma_semaphore, #tpu.memory_space<semaphore_mem>>
      tpu.enqueue_dma source(%63 : memref<1x256xf32, #tpu.memory_space<any>>) target(%64 : memref<1x256xf32, #tpu.memory_space<vmem>>) target_semaphore(%66 : memref<!tpu.dma_semaphore, #tpu.memory_space<semaphore_mem>>)
      %67 = arith.index_cast %60 : i32 to index
      %68 = memref.load %arg2[%67] : memref<16xi32, #tpu.memory_space<smem>>
      %c1_i32_58 = arith.constant 1 : i32
      %c0_i32_59 = arith.constant 0 : i32
      %c0_i32_60 = arith.constant 0 : i32
      %69 = tpu.memref_slice %arg4[%68, %c0_i32_60] : memref<50x256xf32, #tpu.memory_space<any>> -> memref<1x256xf32, #tpu.memory_space<any>>
      %c0_i32_61 = arith.constant 0 : i32
      %70 = tpu.memref_slice %arg10[%59, %c0_i32_61] : memref<16x256xf32, #tpu.memory_space<vmem>> -> memref<1x256xf32, #tpu.memory_space<vmem>>
      %71 = tpu.memref_slice %arg12[%c1_i32_58, %c0_i32_59] : memref<3x2x!tpu.dma_semaphore, #tpu.memory_space<semaphore_mem>> -> memref<1x1x!tpu.dma_semaphore, #tpu.memory_space<semaphore_mem>>
      %72 = tpu.memref_squeeze %71 : memref<1x1x!tpu.dma_semaphore, #tpu.memory_space<semaphore_mem>> -> memref<!tpu.dma_semaphore, #tpu.memory_space<semaphore_mem>>
      tpu.enqueue_dma source(%69 : memref<1x256xf32, #tpu.memory_space<any>>) target(%70 : memref<1x256xf32, #tpu.memory_space<vmem>>) target_semaphore(%72 : memref<!tpu.dma_semaphore, #tpu.memory_space<semaphore_mem>>)
      %73 = arith.index_cast %60 : i32 to index
      %74 = memref.load %arg3[%73] : memref<16xi32, #tpu.memory_space<smem>>
      %c2_i32 = arith.constant 2 : i32
      %c0_i32_62 = arith.constant 0 : i32
      %c0_i32_63 = arith.constant 0 : i32
      %75 = tpu.memref_slice %arg5[%74, %c0_i32_63] : memref<20x256xf32, #tpu.memory_space<any>> -> memref<1x256xf32, #tpu.memory_space<any>>
      %c0_i32_64 = arith.constant 0 : i32
      %76 = tpu.memref_slice %arg11[%59, %c0_i32_64] : memref<16x256xf32, #tpu.memory_space<vmem>> -> memref<1x256xf32, #tpu.memory_space<vmem>>
      %77 = tpu.memref_slice %arg12[%c2_i32, %c0_i32_62] : memref<3x2x!tpu.dma_semaphore, #tpu.memory_space<semaphore_mem>> -> memref<1x1x!tpu.dma_semaphore, #tpu.memory_space<semaphore_mem>>
      %78 = tpu.memref_squeeze %77 : memref<1x1x!tpu.dma_semaphore, #tpu.memory_space<semaphore_mem>> -> memref<!tpu.dma_semaphore, #tpu.memory_space<semaphore_mem>>
      tpu.enqueue_dma source(%75 : memref<1x256xf32, #tpu.memory_space<any>>) target(%76 : memref<1x256xf32, #tpu.memory_space<vmem>>) target_semaphore(%78 : memref<!tpu.dma_semaphore, #tpu.memory_space<semaphore_mem>>)
    }
    %c8_i32_0 = arith.constant 8 : i32
    %c0_i32_1 = arith.constant 0 : i32
    %c8_i32_2 = arith.constant 8 : i32
    %2 = arith.addi %c0_i32_1, %c8_i32_2 : i32
    %c1_i32_3 = arith.constant 1 : i32
    scf.for %arg13 = %c0_i32_1 to %2 step %c1_i32_3  : i32 {
      %c1_i32_51 = arith.constant 1 : i32
      %57 = arith.muli %arg13, %c1_i32_51 : i32
      %c0_i32_52 = arith.constant 0 : i32
      %58 = arith.addi %c0_i32_52, %57 : i32
      %c8_i32_53 = arith.constant 8 : i32
      %59 = arith.addi %c8_i32_53, %58 : i32
      %60 = arith.addi %0, %59 : i32
      %61 = arith.index_cast %60 : i32 to index
      %62 = memref.load %arg1[%61] : memref<16xi32, #tpu.memory_space<smem>>
      %c0_i32_54 = arith.constant 0 : i32
      %c1_i32_55 = arith.constant 1 : i32
      %c0_i32_56 = arith.constant 0 : i32
      %63 = tpu.memref_slice %arg4[%62, %c0_i32_56] : memref<50x256xf32, #tpu.memory_space<any>> -> memref<1x256xf32, #tpu.memory_space<any>>
      %c0_i32_57 = arith.constant 0 : i32
      %64 = tpu.memref_slice %arg9[%59, %c0_i32_57] : memref<16x256xf32, #tpu.memory_space<vmem>> -> memref<1x256xf32, #tpu.memory_space<vmem>>
      %65 = tpu.memref_slice %arg12[%c0_i32_54, %c1_i32_55] : memref<3x2x!tpu.dma_semaphore, #tpu.memory_space<semaphore_mem>> -> memref<1x1x!tpu.dma_semaphore, #tpu.memory_space<semaphore_mem>>
      %66 = tpu.memref_squeeze %65 : memref<1x1x!tpu.dma_semaphore, #tpu.memory_space<semaphore_mem>> -> memref<!tpu.dma_semaphore, #tpu.memory_space<semaphore_mem>>
      tpu.enqueue_dma source(%63 : memref<1x256xf32, #tpu.memory_space<any>>) target(%64 : memref<1x256xf32, #tpu.memory_space<vmem>>) target_semaphore(%66 : memref<!tpu.dma_semaphore, #tpu.memory_space<semaphore_mem>>)
      %67 = arith.index_cast %60 : i32 to index
      %68 = memref.load %arg2[%67] : memref<16xi32, #tpu.memory_space<smem>>
      %c1_i32_58 = arith.constant 1 : i32
      %c1_i32_59 = arith.constant 1 : i32
      %c0_i32_60 = arith.constant 0 : i32
      %69 = tpu.memref_slice %arg4[%68, %c0_i32_60] : memref<50x256xf32, #tpu.memory_space<any>> -> memref<1x256xf32, #tpu.memory_space<any>>
      %c0_i32_61 = arith.constant 0 : i32
      %70 = tpu.memref_slice %arg10[%59, %c0_i32_61] : memref<16x256xf32, #tpu.memory_space<vmem>> -> memref<1x256xf32, #tpu.memory_space<vmem>>
      %71 = tpu.memref_slice %arg12[%c1_i32_58, %c1_i32_59] : memref<3x2x!tpu.dma_semaphore, #tpu.memory_space<semaphore_mem>> -> memref<1x1x!tpu.dma_semaphore, #tpu.memory_space<semaphore_mem>>
      %72 = tpu.memref_squeeze %71 : memref<1x1x!tpu.dma_semaphore, #tpu.memory_space<semaphore_mem>> -> memref<!tpu.dma_semaphore, #tpu.memory_space<semaphore_mem>>
      tpu.enqueue_dma source(%69 : memref<1x256xf32, #tpu.memory_space<any>>) target(%70 : memref<1x256xf32, #tpu.memory_space<vmem>>) target_semaphore(%72 : memref<!tpu.dma_semaphore, #tpu.memory_space<semaphore_mem>>)
      %73 = arith.index_cast %60 : i32 to index
      %74 = memref.load %arg3[%73] : memref<16xi32, #tpu.memory_space<smem>>
      %c2_i32 = arith.constant 2 : i32
      %c1_i32_62 = arith.constant 1 : i32
      %c0_i32_63 = arith.constant 0 : i32
      %75 = tpu.memref_slice %arg5[%74, %c0_i32_63] : memref<20x256xf32, #tpu.memory_space<any>> -> memref<1x256xf32, #tpu.memory_space<any>>
      %c0_i32_64 = arith.constant 0 : i32
      %76 = tpu.memref_slice %arg11[%59, %c0_i32_64] : memref<16x256xf32, #tpu.memory_space<vmem>> -> memref<1x256xf32, #tpu.memory_space<vmem>>
      %77 = tpu.memref_slice %arg12[%c2_i32, %c1_i32_62] : memref<3x2x!tpu.dma_semaphore, #tpu.memory_space<semaphore_mem>> -> memref<1x1x!tpu.dma_semaphore, #tpu.memory_space<semaphore_mem>>
      %78 = tpu.memref_squeeze %77 : memref<1x1x!tpu.dma_semaphore, #tpu.memory_space<semaphore_mem>> -> memref<!tpu.dma_semaphore, #tpu.memory_space<semaphore_mem>>
      tpu.enqueue_dma source(%75 : memref<1x256xf32, #tpu.memory_space<any>>) target(%76 : memref<1x256xf32, #tpu.memory_space<vmem>>) target_semaphore(%78 : memref<!tpu.dma_semaphore, #tpu.memory_space<semaphore_mem>>)
    }
    %c8_i32_4 = arith.constant 8 : i32
    %c0_i32_5 = arith.constant 0 : i32
    %c8_i32_6 = arith.constant 8 : i32
    %3 = arith.addi %c0_i32_5, %c8_i32_6 : i32
    %c1_i32_7 = arith.constant 1 : i32
    scf.for %arg13 = %c0_i32_5 to %3 step %c1_i32_7  : i32 {
      %c1_i32_51 = arith.constant 1 : i32
      %57 = arith.muli %arg13, %c1_i32_51 : i32
      %c0_i32_52 = arith.constant 0 : i32
      %58 = arith.addi %c0_i32_52, %57 : i32
      %c0_i32_53 = arith.constant 0 : i32
      %59 = arith.addi %c0_i32_53, %58 : i32
      %c0_i32_54 = arith.constant 0 : i32
      %c0_i32_55 = arith.constant 0 : i32
      %c0_i32_56 = arith.constant 0 : i32
      %c0_i32_57 = arith.constant 0 : i32
      %60 = tpu.memref_slice %arg4[%c0_i32_56, %c0_i32_57] : memref<50x256xf32, #tpu.memory_space<any>> -> memref<1x256xf32, #tpu.memory_space<any>>
      %c0_i32_58 = arith.constant 0 : i32
      %61 = tpu.memref_slice %arg9[%59, %c0_i32_58] : memref<16x256xf32, #tpu.memory_space<vmem>> -> memref<1x256xf32, #tpu.memory_space<vmem>>
      %62 = tpu.memref_slice %arg12[%c0_i32_54, %c0_i32_55] : memref<3x2x!tpu.dma_semaphore, #tpu.memory_space<semaphore_mem>> -> memref<1x1x!tpu.dma_semaphore, #tpu.memory_space<semaphore_mem>>
      %63 = tpu.memref_squeeze %62 : memref<1x1x!tpu.dma_semaphore, #tpu.memory_space<semaphore_mem>> -> memref<!tpu.dma_semaphore, #tpu.memory_space<semaphore_mem>>
      tpu.wait_dma2 semaphore(%63 : memref<!tpu.dma_semaphore, #tpu.memory_space<semaphore_mem>>) src(%60 : memref<1x256xf32, #tpu.memory_space<any>>) dst(%61 : memref<1x256xf32, #tpu.memory_space<vmem>>)
      %c1_i32_59 = arith.constant 1 : i32
      %c0_i32_60 = arith.constant 0 : i32
      %c0_i32_61 = arith.constant 0 : i32
      %c0_i32_62 = arith.constant 0 : i32
      %64 = tpu.memref_slice %arg4[%c0_i32_61, %c0_i32_62] : memref<50x256xf32, #tpu.memory_space<any>> -> memref<1x256xf32, #tpu.memory_space<any>>
      %c0_i32_63 = arith.constant 0 : i32
      %65 = tpu.memref_slice %arg10[%59, %c0_i32_63] : memref<16x256xf32, #tpu.memory_space<vmem>> -> memref<1x256xf32, #tpu.memory_space<vmem>>
      %66 = tpu.memref_slice %arg12[%c1_i32_59, %c0_i32_60] : memref<3x2x!tpu.dma_semaphore, #tpu.memory_space<semaphore_mem>> -> memref<1x1x!tpu.dma_semaphore, #tpu.memory_space<semaphore_mem>>
      %67 = tpu.memref_squeeze %66 : memref<1x1x!tpu.dma_semaphore, #tpu.memory_space<semaphore_mem>> -> memref<!tpu.dma_semaphore, #tpu.memory_space<semaphore_mem>>
      tpu.wait_dma2 semaphore(%67 : memref<!tpu.dma_semaphore, #tpu.memory_space<semaphore_mem>>) src(%64 : memref<1x256xf32, #tpu.memory_space<any>>) dst(%65 : memref<1x256xf32, #tpu.memory_space<vmem>>)
      %c2_i32 = arith.constant 2 : i32
      %c0_i32_64 = arith.constant 0 : i32
      %c0_i32_65 = arith.constant 0 : i32
      %c0_i32_66 = arith.constant 0 : i32
      %68 = tpu.memref_slice %arg5[%c0_i32_65, %c0_i32_66] : memref<20x256xf32, #tpu.memory_space<any>> -> memref<1x256xf32, #tpu.memory_space<any>>
      %c0_i32_67 = arith.constant 0 : i32
      %69 = tpu.memref_slice %arg11[%59, %c0_i32_67] : memref<16x256xf32, #tpu.memory_space<vmem>> -> memref<1x256xf32, #tpu.memory_space<vmem>>
      %70 = tpu.memref_slice %arg12[%c2_i32, %c0_i32_64] : memref<3x2x!tpu.dma_semaphore, #tpu.memory_space<semaphore_mem>> -> memref<1x1x!tpu.dma_semaphore, #tpu.memory_space<semaphore_mem>>
      %71 = tpu.memref_squeeze %70 : memref<1x1x!tpu.dma_semaphore, #tpu.memory_space<semaphore_mem>> -> memref<!tpu.dma_semaphore, #tpu.memory_space<semaphore_mem>>
      tpu.wait_dma2 semaphore(%71 : memref<!tpu.dma_semaphore, #tpu.memory_space<semaphore_mem>>) src(%68 : memref<1x256xf32, #tpu.memory_space<any>>) dst(%69 : memref<1x256xf32, #tpu.memory_space<vmem>>)
    }
    %c8_i32_8 = arith.constant 8 : i32
    %c0 = arith.constant 0 : index
    %c0_9 = arith.constant 0 : index
    %4 = vector.load %arg9[%c0, %c0_9] : memref<16x256xf32, #tpu.memory_space<vmem>>, vector<8x128xf32>
    %c0_10 = arith.constant 0 : index
    %c128 = arith.constant 128 : index
    %5 = vector.load %arg9[%c0_10, %c128] : memref<16x256xf32, #tpu.memory_space<vmem>>, vector<8x128xf32>
    %c0_11 = arith.constant 0 : index
    %c0_12 = arith.constant 0 : index
    %6 = vector.load %arg10[%c0_11, %c0_12] : memref<16x256xf32, #tpu.memory_space<vmem>>, vector<8x128xf32>
    %c0_13 = arith.constant 0 : index
    %c128_14 = arith.constant 128 : index
    %7 = vector.load %arg10[%c0_13, %c128_14] : memref<16x256xf32, #tpu.memory_space<vmem>>, vector<8x128xf32>
    %c0_15 = arith.constant 0 : index
    %c0_16 = arith.constant 0 : index
    %8 = vector.load %arg11[%c0_15, %c0_16] : memref<16x256xf32, #tpu.memory_space<vmem>>, vector<8x128xf32>
    %c0_17 = arith.constant 0 : index
    %c128_18 = arith.constant 128 : index
    %9 = vector.load %arg11[%c0_17, %c128_18] : memref<16x256xf32, #tpu.memory_space<vmem>>, vector<8x128xf32>
    %10 = arith.mulf %4, %5 : vector<8x128xf32>
    %cst = arith.constant dense<0.000000e+00> : vector<8xf32>
    %11 = vector.multi_reduction <add>, %10, %cst [1] : vector<8x128xf32> to vector<8xf32>
    %12 = vector.shape_cast %11 : vector<8xf32> to vector<8x1xf32>
    %13 = arith.mulf %6, %7 : vector<8x128xf32>
    %cst_19 = arith.constant dense<0.000000e+00> : vector<8xf32>
    %14 = vector.multi_reduction <add>, %13, %cst_19 [1] : vector<8x128xf32> to vector<8xf32>
    %15 = vector.shape_cast %14 : vector<8xf32> to vector<8x1xf32>
    %16 = vector.broadcast %12 : vector<8x1xf32> to vector<8x128xf32>
    %17 = arith.mulf %16, %9 : vector<8x128xf32>
    %18 = arith.addf %4, %17 : vector<8x128xf32>
    %19 = vector.broadcast %15 : vector<8x1xf32> to vector<8x128xf32>
    %20 = arith.mulf %19, %9 : vector<8x128xf32>
    %21 = arith.addf %6, %20 : vector<8x128xf32>
    %22 = arith.addf %18, %8 : vector<8x128xf32>
    %23 = arith.subf %22, %21 : vector<8x128xf32>
    %24 = math.absf %23 : vector<8x128xf32>
    %cst_20 = arith.constant dense<0.000000e+00> : vector<8xf32>
    %25 = vector.multi_reduction <add>, %24, %cst_20 [1] : vector<8x128xf32> to vector<8xf32>
    %26 = vector.shape_cast %25 : vector<8xf32> to vector<8x1xf32>
    %c0_21 = arith.constant 0 : index
    %c0_22 = arith.constant 0 : index
    %27 = vector.load %arg6[%c0_21, %c0_22] : memref<16x1xf32, #tpu.memory_space<vmem>>, vector<8x1xf32>
    tpu.vector_store %arg6[%c0_21, %c0_22], %26 {strides = array<i32>} : memref<16x1xf32, #tpu.memory_space<vmem>>, vector<8x1xf32>,
    %c0_23 = arith.constant 0 : index
    %c0_24 = arith.constant 0 : index
    %28 = vector.load %arg7[%c0_23, %c0_24] : memref<16x128xf32, #tpu.memory_space<vmem>>, vector<8x128xf32>
    tpu.vector_store %arg7[%c0_23, %c0_24], %18 {strides = array<i32>} : memref<16x128xf32, #tpu.memory_space<vmem>>, vector<8x128xf32>,
    %c0_25 = arith.constant 0 : index
    %c0_26 = arith.constant 0 : index
    %29 = vector.load %arg8[%c0_25, %c0_26] : memref<16x128xf32, #tpu.memory_space<vmem>>, vector<8x128xf32>
    tpu.vector_store %arg8[%c0_25, %c0_26], %21 {strides = array<i32>} : memref<16x128xf32, #tpu.memory_space<vmem>>, vector<8x128xf32>,
    %c0_i32_27 = arith.constant 0 : i32
    %c8_i32_28 = arith.constant 8 : i32
    %30 = arith.addi %c0_i32_27, %c8_i32_28 : i32
    %c1_i32_29 = arith.constant 1 : i32
    scf.for %arg13 = %c0_i32_27 to %30 step %c1_i32_29  : i32 {
      %c1_i32_51 = arith.constant 1 : i32
      %57 = arith.muli %arg13, %c1_i32_51 : i32
      %c0_i32_52 = arith.constant 0 : i32
      %58 = arith.addi %c0_i32_52, %57 : i32
      %c8_i32_53 = arith.constant 8 : i32
      %59 = arith.addi %c8_i32_53, %58 : i32
      %c0_i32_54 = arith.constant 0 : i32
      %c1_i32_55 = arith.constant 1 : i32
      %c0_i32_56 = arith.constant 0 : i32
      %c0_i32_57 = arith.constant 0 : i32
      %60 = tpu.memref_slice %arg4[%c0_i32_56, %c0_i32_57] : memref<50x256xf32, #tpu.memory_space<any>> -> memref<1x256xf32, #tpu.memory_space<any>>
      %c0_i32_58 = arith.constant 0 : i32
      %61 = tpu.memref_slice %arg9[%59, %c0_i32_58] : memref<16x256xf32, #tpu.memory_space<vmem>> -> memref<1x256xf32, #tpu.memory_space<vmem>>
      %62 = tpu.memref_slice %arg12[%c0_i32_54, %c1_i32_55] : memref<3x2x!tpu.dma_semaphore, #tpu.memory_space<semaphore_mem>> -> memref<1x1x!tpu.dma_semaphore, #tpu.memory_space<semaphore_mem>>
      %63 = tpu.memref_squeeze %62 : memref<1x1x!tpu.dma_semaphore, #tpu.memory_space<semaphore_mem>> -> memref<!tpu.dma_semaphore, #tpu.memory_space<semaphore_mem>>
      tpu.wait_dma2 semaphore(%63 : memref<!tpu.dma_semaphore, #tpu.memory_space<semaphore_mem>>) src(%60 : memref<1x256xf32, #tpu.memory_space<any>>) dst(%61 : memref<1x256xf32, #tpu.memory_space<vmem>>)
      %c1_i32_59 = arith.constant 1 : i32
      %c1_i32_60 = arith.constant 1 : i32
      %c0_i32_61 = arith.constant 0 : i32
      %c0_i32_62 = arith.constant 0 : i32
      %64 = tpu.memref_slice %arg4[%c0_i32_61, %c0_i32_62] : memref<50x256xf32, #tpu.memory_space<any>> -> memref<1x256xf32, #tpu.memory_space<any>>
      %c0_i32_63 = arith.constant 0 : i32
      %65 = tpu.memref_slice %arg10[%59, %c0_i32_63] : memref<16x256xf32, #tpu.memory_space<vmem>> -> memref<1x256xf32, #tpu.memory_space<vmem>>
      %66 = tpu.memref_slice %arg12[%c1_i32_59, %c1_i32_60] : memref<3x2x!tpu.dma_semaphore, #tpu.memory_space<semaphore_mem>> -> memref<1x1x!tpu.dma_semaphore, #tpu.memory_space<semaphore_mem>>
      %67 = tpu.memref_squeeze %66 : memref<1x1x!tpu.dma_semaphore, #tpu.memory_space<semaphore_mem>> -> memref<!tpu.dma_semaphore, #tpu.memory_space<semaphore_mem>>
      tpu.wait_dma2 semaphore(%67 : memref<!tpu.dma_semaphore, #tpu.memory_space<semaphore_mem>>) src(%64 : memref<1x256xf32, #tpu.memory_space<any>>) dst(%65 : memref<1x256xf32, #tpu.memory_space<vmem>>)
      %c2_i32 = arith.constant 2 : i32
      %c1_i32_64 = arith.constant 1 : i32
      %c0_i32_65 = arith.constant 0 : i32
      %c0_i32_66 = arith.constant 0 : i32
      %68 = tpu.memref_slice %arg5[%c0_i32_65, %c0_i32_66] : memref<20x256xf32, #tpu.memory_space<any>> -> memref<1x256xf32, #tpu.memory_space<any>>
      %c0_i32_67 = arith.constant 0 : i32
      %69 = tpu.memref_slice %arg11[%59, %c0_i32_67] : memref<16x256xf32, #tpu.memory_space<vmem>> -> memref<1x256xf32, #tpu.memory_space<vmem>>
      %70 = tpu.memref_slice %arg12[%c2_i32, %c1_i32_64] : memref<3x2x!tpu.dma_semaphore, #tpu.memory_space<semaphore_mem>> -> memref<1x1x!tpu.dma_semaphore, #tpu.memory_space<semaphore_mem>>
      %71 = tpu.memref_squeeze %70 : memref<1x1x!tpu.dma_semaphore, #tpu.memory_space<semaphore_mem>> -> memref<!tpu.dma_semaphore, #tpu.memory_space<semaphore_mem>>
      tpu.wait_dma2 semaphore(%71 : memref<!tpu.dma_semaphore, #tpu.memory_space<semaphore_mem>>) src(%68 : memref<1x256xf32, #tpu.memory_space<any>>) dst(%69 : memref<1x256xf32, #tpu.memory_space<vmem>>)
    }
    %c8_i32_30 = arith.constant 8 : i32
    %c8 = arith.constant 8 : index
    %c0_31 = arith.constant 0 : index
    %31 = vector.load %arg9[%c8, %c0_31] : memref<16x256xf32, #tpu.memory_space<vmem>>, vector<8x128xf32>
    %c8_32 = arith.constant 8 : index
    %c128_33 = arith.constant 128 : index
    %32 = vector.load %arg9[%c8_32, %c128_33] : memref<16x256xf32, #tpu.memory_space<vmem>>, vector<8x128xf32>
    %c8_34 = arith.constant 8 : index
    %c0_35 = arith.constant 0 : index
    %33 = vector.load %arg10[%c8_34, %c0_35] : memref<16x256xf32, #tpu.memory_space<vmem>>, vector<8x128xf32>
    %c8_36 = arith.constant 8 : index
    %c128_37 = arith.constant 128 : index
    %34 = vector.load %arg10[%c8_36, %c128_37] : memref<16x256xf32, #tpu.memory_space<vmem>>, vector<8x128xf32>
    %c8_38 = arith.constant 8 : index
    %c0_39 = arith.constant 0 : index
    %35 = vector.load %arg11[%c8_38, %c0_39] : memref<16x256xf32, #tpu.memory_space<vmem>>, vector<8x128xf32>
    %c8_40 = arith.constant 8 : index
    %c128_41 = arith.constant 128 : index
    %36 = vector.load %arg11[%c8_40, %c128_41] : memref<16x256xf32, #tpu.memory_space<vmem>>, vector<8x128xf32>
    %37 = arith.mulf %31, %32 : vector<8x128xf32>
    %cst_42 = arith.constant dense<0.000000e+00> : vector<8xf32>
    %38 = vector.multi_reduction <add>, %37, %cst_42 [1] : vector<8x128xf32> to vector<8xf32>
    %39 = vector.shape_cast %38 : vector<8xf32> to vector<8x1xf32>
    %40 = arith.mulf %33, %34 : vector<8x128xf32>
    %cst_43 = arith.constant dense<0.000000e+00> : vector<8xf32>
    %41 = vector.multi_reduction <add>, %40, %cst_43 [1] : vector<8x128xf32> to vector<8xf32>
    %42 = vector.shape_cast %41 : vector<8xf32> to vector<8x1xf32>
    %43 = vector.broadcast %39 : vector<8x1xf32> to vector<8x128xf32>
    %44 = arith.mulf %43, %36 : vector<8x128xf32>
    %45 = arith.addf %31, %44 : vector<8x128xf32>
    %46 = vector.broadcast %42 : vector<8x1xf32> to vector<8x128xf32>
    %47 = arith.mulf %46, %36 : vector<8x128xf32>
    %48 = arith.addf %33, %47 : vector<8x128xf32>
    %49 = arith.addf %45, %35 : vector<8x128xf32>
    %50 = arith.subf %49, %48 : vector<8x128xf32>
    %51 = math.absf %50 : vector<8x128xf32>
    %cst_44 = arith.constant dense<0.000000e+00> : vector<8xf32>
    %52 = vector.multi_reduction <add>, %51, %cst_44 [1] : vector<8x128xf32> to vector<8xf32>
    %53 = vector.shape_cast %52 : vector<8xf32> to vector<8x1xf32>
    %c8_45 = arith.constant 8 : index
    %c0_46 = arith.constant 0 : index
    %54 = vector.load %arg6[%c8_45, %c0_46] : memref<16x1xf32, #tpu.memory_space<vmem>>, vector<8x1xf32>
    tpu.vector_store %arg6[%c8_45, %c0_46], %53 {strides = array<i32>} : memref<16x1xf32, #tpu.memory_space<vmem>>, vector<8x1xf32>,
    %c8_47 = arith.constant 8 : index
    %c0_48 = arith.constant 0 : index
    %55 = vector.load %arg7[%c8_47, %c0_48] : memref<16x128xf32, #tpu.memory_space<vmem>>, vector<8x128xf32>
    tpu.vector_store %arg7[%c8_47, %c0_48], %45 {strides = array<i32>} : memref<16x128xf32, #tpu.memory_space<vmem>>, vector<8x128xf32>,
    %c8_49 = arith.constant 8 : index
    %c0_50 = arith.constant 0 : index
    %56 = vector.load %arg8[%c8_49, %c0_50] : memref<16x128xf32, #tpu.memory_space<vmem>>, vector<8x128xf32>
    tpu.vector_store %arg8[%c8_49, %c0_50], %48 {strides = array<i32>} : memref<16x128xf32, #tpu.memory_space<vmem>>, vector<8x128xf32>,
    return
  }
  func.func @transform_2(%arg0: i32, %arg1: memref<16xi32, #tpu.memory_space<smem>>, %arg2: memref<16xi32, #tpu.memory_space<smem>>, %arg3: memref<16xi32, #tpu.memory_space<smem>>) -> (i32, i32) {
    %c0_i32 = arith.constant 0 : i32
    %c0_i32_0 = arith.constant 0 : i32
    return %arg0, %c0_i32 : i32, i32
  }
  func.func @transform_3(%arg0: i32, %arg1: memref<16xi32, #tpu.memory_space<smem>>, %arg2: memref<16xi32, #tpu.memory_space<smem>>, %arg3: memref<16xi32, #tpu.memory_space<smem>>) -> (i32, i32) {
    %c0_i32 = arith.constant 0 : i32
    %c0_i32_0 = arith.constant 0 : i32
    return %arg0, %c0_i32 : i32, i32
  }
  func.func @transform_4(%arg0: i32, %arg1: memref<16xi32, #tpu.memory_space<smem>>, %arg2: memref<16xi32, #tpu.memory_space<smem>>, %arg3: memref<16xi32, #tpu.memory_space<smem>>) -> (i32, i32) {
    %c0_i32 = arith.constant 0 : i32
    %c0_i32_0 = arith.constant 0 : i32
    return %arg0, %c0_i32 : i32, i32
  }
}

</mosaic_0001>

<bundles_post_ra>
// kernel: transd_forward_fused.1
= control target key start
LH: loop header
LB: loop body
LE: loop exit
PB: predicated region body
PF: predicated region fallthrough
CT: control target
= control target key end

     0   :  { %s969_s0 = inlined_call_operand.vmem [shape: s32[16], index: 0, kind: input, shape index: {}]   ;;  %s970_s3 = inlined_call_operand.hbm [shape: f32[50,256], index: 3, kind: input, shape index: {}]   ;;  %s971_s4 = inlined_call_operand.hbm [shape: f32[20,256], index: 4, kind: input, shape index: {}]   ;;  %s972_s5 = inlined_call_operand.vmem [shape: f32[16,1], index: 5, kind: output, shape index: {0}]   ;;  %s973_s6 = inlined_call_operand.hbm [shape: f32[16,128], index: 6, kind: output, shape index: {1}]   ;;  %s974_s7 = inlined_call_operand.hbm [shape: f32[16,128], index: 7, kind: output, shape index: {2}]   ;;  %s975_s1 = inlined_call_operand.vmem [shape: s32[16], index: 1, kind: input, shape index: {}]   ;;  %s976_s2 = inlined_call_operand.vmem [shape: s32[16], index: 2, kind: input, shape index: {}]  }
   0x1   :  { %s13_s26 = sshll.u32 %s969_s0, 4  ;;  %s17_s29 = sshll.u32 %s975_s1, 4  ;;  %s14_s26 = int_to_ptr.vmem [resolvable:$true] %s13_s26  ;;  %s18_s29 = int_to_ptr.vmem [resolvable:$true] %s17_s29 }
   0x2   :  { %s418_s30 = scalar_lea.vmem %s14_s26, 16  ;;  %p423_p1 = scmp.lt.s32.totalorder %s14_s26, %s14_s26 }
   0x3   :  { %p419_p0 = scmp.ne.s32.totalorder %s14_s26, %s418_s30  ;;  %p424_p2 = scmp.lt.s32.totalorder %s418_s30, %s418_s30 }
   0x5   :  { %p425_p3 = por %p424_p2, %p423_p1 }
   0x7   :  { %p426_p4 = pnand %p425_p3, %p419_p0 }
   0x9   :  { %429 = shalt.err (!%p426_p4)  }
   0xa   :  { %s692_s8 = smov [#allocation7]   ;;  %s430_s9 = scalar_lea.vmem %s18_s29, 16 }
   0xb   :  { %16 = dma.vmem_to_smem %s14_s26, 16, %s692_s8, [#allocation6] }
   0xc   :  { %p431_p5 = scmp.ne.s32.totalorder %s18_s29, %s430_s9  ;;  %p435_p6 = scmp.lt.s32.totalorder %s18_s29, %s18_s29 }
   0xd   :  { %p436_p7 = scmp.lt.s32.totalorder %s430_s9, %s430_s9 }
   0xf   :  { %p437_p8 = por %p436_p7, %p435_p6 }
  0x11   :  { %p438_p9 = pnand %p437_p8, %p431_p5 }
  0x13   :  { %441 = shalt.err (!%p438_p9)  }
  0x14   :  { %s693_s0 = smov [#allocation8]   ;;  %s21_s11 = sshll.u32 %s976_s2, 4  ;;  %s22_s11 = int_to_ptr.vmem [resolvable:$true] %s21_s11 }
  0x15   :  { %20 = dma.vmem_to_smem %s18_s29, 16, %s693_s0, [#allocation6] }
  0x16   :  { %s442_s12 = scalar_lea.vmem %s22_s11, 16  ;;  %p447_p11 = scmp.lt.s32.totalorder %s22_s11, %s22_s11 }
  0x17   :  { %p443_p10 = scmp.ne.s32.totalorder %s22_s11, %s442_s12  ;;  %p448_p12 = scmp.lt.s32.totalorder %s442_s12, %s442_s12 }
  0x19   :  { %p449_p13 = por %p448_p12, %p447_p11 }
  0x1b   :  { %p450_p0 = pnand %p449_p13, %p443_p10 }
  0x1d   :  { %453 = shalt.err (!%p450_p0)  }
  0x1e   :  { %s694_s13 = smov [#allocation9]  }
  0x1f   :  { %24 = dma.vmem_to_smem %s22_s11, 16, %s694_s13, [#allocation6] }
  0x20   :  { %658 = dma.done.wait [#allocation6], 48 }
  0x21   :  { %659 = vsyncadd [#allocation6], 4294967248 }
  0x22   :  { %26 = sfence }
  0x23   :  { %27 = vsyncpa [#allocation11], 0 }
  0x24   :  { %28 = vsyncpa [#allocation13], 0  ;;  %s755_s14 = smov 0  }
  0x25 LB: > { %s37_s2 = sld [smem:[#allocation7 + %s678_s14]]  ;;  %s44_s15 = sshrl.u32 %s678_s14, 3  ;;  %s678_s14 = sphi %s755_s14, %s35_s14  }
  0x26   : > { %s45_s16 = sand.u32 7, %s678_s14   ;;  %s357_s17 = sshll.u32 %s44_s15, 4 }
  0x27   : > { %s763_s18 = sadd.s32 %s357_s17, %s45_s16  ;;  %s766_s19 = sld [smem:[#allocation8 + %s678_s14]] }
  0x28   : > { %s48_s20 = scalar_lea.vmem [#allocation2], %s763_s18  ;;  %s61_s22 = scalar_lea.vmem [#allocation3], %s763_s18 }
  0x29   : > { %s50_s21 = sshll.u32 %s48_s20, 4  ;;  %s64_s23 = sshll.u32 %s61_s22, 4  ;;  %s770_s21 = int_to_ptr.vmem [resolvable:$true] %s50_s21  ;;  %s772_s23 = int_to_ptr.vmem [resolvable:$true] %s64_s23 }
  0x2a   : > { %s775_s27 = sld [smem:[#allocation9 + %s678_s14]]  ;;  %s785_s15 = scalar_lea.hbm %s970_s3, 1792 }
  0x2b   : > { %s38_s24 = sshrl.u32 %s37_s2, 3  ;;  %s39_s25 = sand.u32 7, %s37_s2  }
  0x2c   : > { %s355_s26 = sshll.u32 %s38_s24, 4 }
  0x2d   : > { %s41_s28 = sadd.s32 %s355_s26, %s39_s25  ;;  %s55_s29 = sshrl.u32 %s766_s19, 3 }
  0x2e   : > { %s356_s30 = sshll.u32 %s41_s28, 4  ;;  %s56_s8 = sand.u32 7, %s766_s19  }
  0x2f   : > { %s43_s1 = scalar_lea.hbm %s970_s3, %s356_s30  ;;  %s358_s10 = sshll.u32 %s55_s29, 4 }
  0x30   : > { %s454_s11 = scalar_lea.hbm %s43_s1, 32  ;;  %p457_p2 = scmp.lt.u32.totalorder %s43_s1, %s970_s3 }
  0x31   : > { %p455_p1 = scmp.ne.s32.totalorder %s43_s1, %s454_s11  ;;  %p458_p3 = scmp.lt.u32.totalorder %s785_s15, %s454_s11 }
  0x32   : > { %p460_p5 = scmp.lt.u32.totalorder %s454_s11, %s43_s1 }
  0x33   : > { %p459_p4 = por %p458_p3, %p457_p2 }
  0x35   : > { %p461_p6 = por %p460_p5, %p459_p4 }
  0x37   : > { %p462_p7 = pnand %p461_p6, %p455_p1 }
  0x39   : > { %465 = shalt.err (!%p462_p7)  }
  0x3a   : > { %s466_s17 = scalar_lea.vmem %s770_s21, 32  ;;  %s695_s20 = smov [#allocation2]  }
  0x3b   : > { %p467_p8 = scmp.ne.s32.totalorder %s770_s21, %s466_s17  ;;  %s468_s22 = sshll.u32 %s695_s20, 4  ;;  %s793_s22 = int_to_ptr.vmem [resolvable:$false] %s468_s22 }
  0x3c   : > { %s980_s24 = scalar_lea.vmem %s793_s22, 512  ;;  %p471_p9 = scmp.lt.s32.totalorder %s770_s21, %s793_s22 }
  0x3d   : > { %p472_p10 = scmp.lt.s32.totalorder %s980_s24, %s466_s17 }
  0x3f   : > { %p473_p11 = por %p472_p10, %p471_p9 }
  0x41   : > { %p474_p12 = pnand %p473_p11, %p467_p8 }
  0x43   : > { %477 = shalt.err (!%p474_p12)  }
  0x44   : > { %s696_s25 = smov 128   ;;  %s697_s26 = smov 1  }
  0x45   : > { %53 = dma.hbm_to_vmem [thread:$0]  %s43_s1, 32, %s770_s21, [#allocation5], %s696_s25, %s696_s25, %s697_s26 }
  0x46   : > { %s58_s28 = sadd.s32 %s358_s10, %s56_s8  ;;  %s69_s30 = sshrl.u32 %s775_s27, 3 }
  0x47   : > { %s359_s29 = sshll.u32 %s58_s28, 4  ;;  %s70_s12 = sand.u32 7, %s775_s27  }
  0x48   : > { %s60_s11 = scalar_lea.hbm %s970_s3, %s359_s29 }
  0x49   : > { %s478_s13 = scalar_lea.hbm %s60_s11, 32  ;;  %p481_p0 = scmp.lt.u32.totalorder %s60_s11, %s970_s3 }
  0x4a   : > { %p479_p13 = scmp.ne.s32.totalorder %s60_s11, %s478_s13  ;;  %p482_p1 = scmp.lt.u32.totalorder %s785_s15, %s478_s13 }
  0x4b   : > { %p484_p3 = scmp.lt.u32.totalorder %s478_s13, %s60_s11 }
  0x4c   : > { %p483_p2 = por %p482_p1, %p481_p0 }
  0x4e   : > { %p485_p4 = por %p484_p3, %p483_p2 }
  0x50   : > { %p486_p5 = pnand %p485_p4, %p479_p13 }
  0x52   : > { %489 = shalt.err (!%p486_p5)  }
  0x53   : > { %s490_s19 = scalar_lea.vmem %s772_s23, 32  ;;  %s698_s21 = smov [#allocation3]  }
  0x54   : > { %p491_p6 = scmp.ne.s32.totalorder %s772_s23, %s490_s19  ;;  %s492_s8 = sshll.u32 %s698_s21, 4  ;;  %s817_s8 = int_to_ptr.vmem [resolvable:$false] %s492_s8 }
  0x55   : > { %s977_s27 = scalar_lea.vmem %s817_s8, 512  ;;  %p495_p7 = scmp.lt.s32.totalorder %s772_s23, %s817_s8 }
  0x56   : > { %p496_p8 = scmp.lt.s32.totalorder %s977_s27, %s490_s19 }
  0x58   : > { %p497_p9 = por %p496_p8, %p495_p7 }
  0x5a   : > { %p498_p10 = pnand %p497_p9, %p491_p6 }
  0x5c   : > { %501 = shalt.err (!%p498_p10)  }
  0x5d   : > { %67 = dma.hbm_to_vmem [thread:$0]  %s60_s11, 32, %s772_s23, [#allocation5 + $0x2], %s696_s25, %s696_s25, %s697_s26 }
  0x5e   : > { %s360_s1 = sshll.u32 %s69_s30, 4  ;;  %s75_s10 = scalar_lea.vmem [#allocation4], %s763_s18 }
  0x5f   : > { %s78_s17 = sshll.u32 %s75_s10, 4  ;;  %s72_s20 = sadd.s32 %s360_s1, %s70_s12  ;;  %s79_s17 = int_to_ptr.vmem [resolvable:$true] %s78_s17 }
  0x60   : > { %s361_s28 = sshll.u32 %s72_s20, 4  ;;  %s979_s19 = scalar_lea.hbm %s971_s4, 768 }
  0x61   : > { %s74_s0 = scalar_lea.hbm %s971_s4, %s361_s28 }
  0x62   : > { %s502_s13 = scalar_lea.hbm %s74_s0, 32  ;;  %p505_p12 = scmp.lt.u32.totalorder %s74_s0, %s971_s4 }
  0x63   : > { %p503_p11 = scmp.ne.s32.totalorder %s74_s0, %s502_s13  ;;  %p506_p13 = scmp.lt.u32.totalorder %s979_s19, %s502_s13 }
  0x64   : > { %p508_p1 = scmp.lt.u32.totalorder %s502_s13, %s74_s0 }
  0x65   : > { %p507_p0 = por %p506_p13, %p505_p12 }
  0x67   : > { %p509_p2 = por %p508_p1, %p507_p0 }
  0x69   : > { %p510_p3 = pnand %p509_p2, %p503_p11 }
  0x6b   : > { %513 = shalt.err (!%p510_p3)  }
  0x6c   : > { %s514_s30 = scalar_lea.vmem %s79_s17, 32  ;;  %s699_s11 = smov [#allocation4]  }
  0x6d   : > { %p515_p4 = scmp.ne.s32.totalorder %s79_s17, %s514_s30  ;;  %s516_s12 = sshll.u32 %s699_s11, 4  ;;  %s842_s12 = int_to_ptr.vmem [resolvable:$false] %s516_s12 }
  0x6e   : > { %s978_s27 = scalar_lea.vmem %s842_s12, 512  ;;  %p519_p5 = scmp.lt.s32.totalorder %s79_s17, %s842_s12 }
  0x6f   : > { %p520_p6 = scmp.lt.s32.totalorder %s978_s27, %s514_s30 }
  0x71   : > { %p521_p7 = por %p520_p6, %p519_p5 }
  0x73   : > { %p522_p8 = pnand %p521_p7, %p515_p4 }
  0x75   : > { %525 = shalt.err (!%p522_p8)  }
  0x76   : > { %81 = dma.hbm_to_vmem [thread:$0]  %s74_s0, 32, %s79_s17, [#allocation5 + $0x4], %s696_s25, %s696_s25, %s697_s26 }
  0x77   : > { %s35_s14 = sadd.s32 1, %s678_s14  }
  0x78   : > { %p32_p9 = scmp.ge.s32.totalorder %s35_s14, 8  }
  0x79   :  { %s854_s1 = smov (%p32_p9), 0  }
  0x7a   :  { %34 = sbr.rel (!%p32_p9) target bundleno = 37 (0x25), region = 91 }
  0x81 LB: > { %s88_s10 = sadd.s32 8, %s682_s1  ;;  %s682_s1 = sphi %s854_s1, %s87_s1  }
  0x82   : > { %s90_s20 = sld [smem:[#allocation7 + %s88_s10]]  ;;  %s97_s28 = sshrl.u32 %s88_s10, 3 }
  0x83   : > { %s98_s29 = sand.u32 7, %s88_s10   ;;  %s364_s9 = sshll.u32 %s97_s28, 4 }
  0x84   : > { %s860_s25 = sadd.s32 %s364_s9, %s98_s29  ;;  %s862_s26 = sld [smem:[#allocation8 + %s88_s10]] }
  0x85   : > { %s101_s14 = scalar_lea.vmem [#allocation2], %s860_s25  ;;  %s115_s0 = scalar_lea.vmem [#allocation3], %s860_s25 }
  0x86   : > { %s104_s17 = sshll.u32 %s101_s14, 4  ;;  %s118_s13 = sshll.u32 %s115_s0, 4  ;;  %s866_s17 = int_to_ptr.vmem [resolvable:$true] %s104_s17  ;;  %s868_s13 = int_to_ptr.vmem [resolvable:$true] %s118_s13 }
  0x87   : > { %s870_s23 = sld [smem:[#allocation9 + %s88_s10]] }
  0x88   : > { %s91_s2 = sshrl.u32 %s90_s20, 3  ;;  %s92_s16 = sand.u32 7, %s90_s20  }
  0x89   : > { %s362_s21 = sshll.u32 %s91_s2, 4 }
  0x8a   : > { %s94_s18 = sadd.s32 %s362_s21, %s92_s16  ;;  %s109_s30 = sshrl.u32 %s862_s26, 3 }
  0x8b   : > { %s363_s11 = sshll.u32 %s94_s18, 4  ;;  %s110_s28 = sand.u32 7, %s862_s26  }
  0x8c   : > { %s96_s14 = scalar_lea.hbm %s970_s3, %s363_s11  ;;  %s365_s27 = sshll.u32 %s109_s30, 4 }
  0x8d   : > { %s526_s0 = scalar_lea.hbm %s96_s14, 32  ;;  %p529_p11 = scmp.lt.u32.totalorder %s96_s14, %s970_s3 }
  0x8e   : > { %p527_p10 = scmp.ne.s32.totalorder %s96_s14, %s526_s0  ;;  %p530_p12 = scmp.lt.u32.totalorder %s785_s15, %s526_s0 }
  0x8f   : > { %p532_p0 = scmp.lt.u32.totalorder %s526_s0, %s96_s14 }
  0x90   : > { %p531_p13 = por %p530_p12, %p529_p11 }
  0x92   : > { %p533_p1 = por %p532_p0, %p531_p13 }
  0x94   : > { %p534_p2 = pnand %p533_p1, %p527_p10 }
  0x96   : > { %537 = shalt.err (!%p534_p2)  }
  0x97   : > { %s538_s10 = scalar_lea.vmem %s866_s17, 32  ;;  %p543_p4 = scmp.lt.s32.totalorder %s866_s17, %s793_s22 }
  0x98   : > { %p539_p3 = scmp.ne.s32.totalorder %s866_s17, %s538_s10  ;;  %s981_s20 = scalar_lea.vmem %s793_s22, 512 }
  0x99   : > { %p544_p5 = scmp.lt.s32.totalorder %s981_s20, %s538_s10 }
  0x9b   : > { %p545_p6 = por %p544_p5, %p543_p4 }
  0x9d   : > { %p546_p7 = pnand %p545_p6, %p539_p3 }
  0x9f   : > { %549 = shalt.err (!%p546_p7)  }
  0xa0   : > { %s700_s24 = smov 128   ;;  %s701_s19 = smov 1  }
  0xa1   : > { %107 = dma.hbm_to_vmem [thread:$0]  %s96_s14, 32, %s866_s17, [#allocation5 + $0x1], %s700_s24, %s700_s24, %s701_s19 }
  0xa2   : > { %s112_s26 = sadd.s32 %s365_s27, %s110_s28  ;;  %s123_s16 = sshrl.u32 %s870_s23, 3 }
  0xa3   : > { %s366_s2 = sshll.u32 %s112_s26, 4  ;;  %s124_s11 = sand.u32 7, %s870_s23  }
  0xa4   : > { %s114_s30 = scalar_lea.hbm %s970_s3, %s366_s2 }
  0xa5   : > { %s550_s29 = scalar_lea.hbm %s114_s30, 32  ;;  %p553_p9 = scmp.lt.u32.totalorder %s114_s30, %s970_s3 }
  0xa6   : > { %p551_p8 = scmp.ne.s32.totalorder %s114_s30, %s550_s29  ;;  %p554_p10 = scmp.lt.u32.totalorder %s785_s15, %s550_s29 }
  0xa7   : > { %p556_p12 = scmp.lt.u32.totalorder %s550_s29, %s114_s30 }
  0xa8   : > { %p555_p11 = por %p554_p10, %p553_p9 }
  0xaa   : > { %p557_p13 = por %p556_p12, %p555_p11 }
  0xac   : > { %p558_p0 = pnand %p557_p13, %p551_p8 }
  0xae   : > { %561 = shalt.err (!%p558_p0)  }
  0xaf   : > { %s562_s27 = scalar_lea.vmem %s868_s13, 32  ;;  %p567_p2 = scmp.lt.s32.totalorder %s868_s13, %s817_s8 }
  0xb0   : > { %p563_p1 = scmp.ne.s32.totalorder %s868_s13, %s562_s27  ;;  %s982_s17 = scalar_lea.vmem %s817_s8, 512 }
  0xb1   : > { %p568_p3 = scmp.lt.s32.totalorder %s982_s17, %s562_s27 }
  0xb3   : > { %p569_p4 = por %p568_p3, %p567_p2 }
  0xb5   : > { %p570_p5 = pnand %p569_p4, %p563_p1 }
  0xb7   : > { %573 = shalt.err (!%p570_p5)  }
  0xb8   : > { %121 = dma.hbm_to_vmem [thread:$0]  %s114_s30, 32, %s868_s13, [#allocation5 + $0x3], %s700_s24, %s700_s24, %s701_s19 }
  0xb9   : > { %s367_s23 = sshll.u32 %s123_s16, 4  ;;  %s129_s28 = scalar_lea.vmem [#allocation4], %s860_s25 }
  0xba   : > { %s132_s14 = sshll.u32 %s129_s28, 4  ;;  %s126_s10 = sadd.s32 %s367_s23, %s124_s11  ;;  %s133_s14 = int_to_ptr.vmem [resolvable:$true] %s132_s14 }
  0xbb   : > { %s368_s20 = sshll.u32 %s126_s10, 4  ;;  %s983_s13 = scalar_lea.hbm %s971_s4, 768 }
  0xbc   : > { %s128_s21 = scalar_lea.hbm %s971_s4, %s368_s20 }
  0xbd   : > { %s574_s18 = scalar_lea.hbm %s128_s21, 32  ;;  %p577_p7 = scmp.lt.u32.totalorder %s128_s21, %s971_s4 }
  0xbe   : > { %p575_p6 = scmp.ne.s32.totalorder %s128_s21, %s574_s18  ;;  %p578_p8 = scmp.lt.u32.totalorder %s983_s13, %s574_s18 }
  0xbf   : > { %p580_p10 = scmp.lt.u32.totalorder %s574_s18, %s128_s21 }
  0xc0   : > { %p579_p9 = por %p578_p8, %p577_p7 }
  0xc2   : > { %p581_p11 = por %p580_p10, %p579_p9 }
  0xc4   : > { %p582_p12 = pnand %p581_p11, %p575_p6 }
  0xc6   : > { %585 = shalt.err (!%p582_p12)  }
  0xc7   : > { %s586_s25 = scalar_lea.vmem %s133_s14, 32  ;;  %p591_p0 = scmp.lt.s32.totalorder %s133_s14, %s842_s12 }
  0xc8   : > { %p587_p13 = scmp.ne.s32.totalorder %s133_s14, %s586_s25  ;;  %s984_s16 = scalar_lea.vmem %s842_s12, 512 }
  0xc9   : > { %p592_p1 = scmp.lt.s32.totalorder %s984_s16, %s586_s25 }
  0xcb   : > { %p593_p2 = por %p592_p1, %p591_p0 }
  0xcd   : > { %p594_p3 = pnand %p593_p2, %p587_p13 }
  0xcf   : > { %597 = shalt.err (!%p594_p3)  }
  0xd0   : > { %135 = dma.hbm_to_vmem [thread:$0]  %s128_s21, 32, %s133_s14, [#allocation5 + $0x5], %s700_s24, %s700_s24, %s701_s19 }
  0xd1   : > { %s87_s1 = sadd.s32 1, %s682_s1  }
  0xd2   : > { %p84_p4 = scmp.ge.s32.totalorder %s87_s1, 8  }
  0xd3   :  { %s684_s30 = smov (%p84_p4), 0  }
  0xd4   :  { %86 = sbr.rel (!%p84_p4) target bundleno = 129 (0x81), region = 102 }
  0xdb LB: > { %660 = dma.done.wait [#allocation5], 32  ;;  %s686_s30 = sphi %s684_s30, %s141_s30  }
  0xdc   : > { %661 = vsyncadd [#allocation5], 4294967264 }
  0xdd   : > { %662 = dma.done.wait [#allocation5 + $0x2], 32 }
  0xde   : > { %663 = vsyncadd [#allocation5 + $0x2], 4294967264 }
  0xdf   : > { %664 = dma.done.wait [#allocation5 + $0x4], 32 }
  0xe0   : > { %665 = vsyncadd [#allocation5 + $0x4], 4294967264  ;;  %s141_s30 = sadd.s32 1, %s686_s30  }
  0xe1   : > { %p138_p5 = scmp.ge.s32.totalorder %s141_s30, 8  }
  0xe2   :  { %v151_v0 = vld [vmem:[#allocation2] sm:$0xff] (%p138_p5)  ;;  %v152_v1 = vld [vmem:[#allocation2 + $0x8] sm:$0xff] (%p138_p5)  ;;  %vm172_vm0 = vcmask (%p138_p5), 7168   ;;  %s688_s15 = smov (%p138_p5), 0  }
  0xe3   :  { %140 = sbr.rel (!%p138_p5) target bundleno = 219 (0xdb), region = 113  ;;  %v153_v2 = vld [vmem:[#allocation3] sm:$0xff] (%p138_p5)  ;;  %v157_v3 = vmul.f32 (%p138_p5), %v152_v1, %v151_v0  ;;  %v154_v4 = vld [vmem:[#allocation3 + $0x8] sm:$0xff] (%p138_p5) }
  0xe4   :  { %v160_v5 = vmul.f32 (%p138_p5), %v154_v4, %v153_v2  ;;  %v156_v6 = vld [vmem:[#allocation4 + $0x8] sm:$0xff] (%p138_p5)  ;;  %v155_v11 = vld [vmem:[#allocation4] sm:$0xff] (%p138_p5) }
  0xe5   :  { %158 = vadd.xlane.f32.xlu0 (%p138_p5), %v157_v3 }
  0xe9   :  { %161 = vadd.xlane.f32.xlu0 (%p138_p5), %v160_v5 }
 0x172   :  { %v159_v7 = vpop.xlane.xlu0 %158 }
 0x173   :  { %v163_v8 = vmul.f32 %v159_v7, %v156_v6 }
 0x175   :  { %v164_v9 = vadd.f32 %v163_v8, %v151_v0 }
 0x176   :  { %v162_v10 = vpop.xlane.xlu0 %161 }
 0x177   :  { %174 = vst [vmem:[#allocation10] sm:$0xff] %v164_v9  ;;  %v165_v12 = vmul.f32 %v162_v10, %v156_v6  ;;  %v167_v14 = vadd.f32 %v164_v9, %v155_v11 }
 0x179   :  { %v166_v13 = vadd.f32 %v165_v12, %v153_v2 }
 0x17b   :  { %v168_v15 = vsub.f32 %v167_v14, %v166_v13  ;;  %175 = vst [vmem:[#allocation12] sm:$0xff] %v166_v13 }
 0x17d   :  { %v169_v16 = vand.u32 2147483647, %v168_v15 }
 0x17f   :  { %170 = vadd.xlane.f32.xlu1 %v169_v16 }
 0x20c   :  { %v171_v17 = vpop.xlane.xlu1 %170 }
 0x20d   :  { %173 = vst.msk [vmem:[%s972_s5] sm:$0xff] %vm172_vm0, %v171_v17 }
 0x20e LB: > { %666 = dma.done.wait [#allocation5 + $0x1], 32  ;;  %s690_s15 = sphi %s688_s15, %s181_s15  }
 0x20f   : > { %667 = vsyncadd [#allocation5 + $0x1], 4294967264 }
 0x210   : > { %668 = dma.done.wait [#allocation5 + $0x3], 32 }
 0x211   : > { %669 = vsyncadd [#allocation5 + $0x3], 4294967264 }
 0x212   : > { %670 = dma.done.wait [#allocation5 + $0x5], 32 }
 0x213   : > { %671 = vsyncadd [#allocation5 + $0x5], 4294967264  ;;  %s181_s15 = sadd.s32 1, %s690_s15  }
 0x214   : > { %p178_p6 = scmp.ge.s32.totalorder %s181_s15, 8  }
 0x215   :  { %v192_v18 = vld [vmem:[#allocation2 + $0x10] sm:$0xff] (%p178_p6)  ;;  %v193_v19 = vld [vmem:[#allocation2 + $0x18] sm:$0xff] (%p178_p6)  ;;  %s702_s22 = smov (%p178_p6), [#allocation10]   ;;  %s703_s12 = smov (%p178_p6), [#allocation12]  }
 0x216   :  { %180 = sbr.rel (!%p178_p6) target bundleno = 526 (0x20e), region = 124  ;;  %v194_v20 = vld [vmem:[#allocation3 + $0x10] sm:$0xff] (%p178_p6)  ;;  %v198_v21 = vmul.f32 (%p178_p6), %v193_v19, %v192_v18  ;;  %v195_v22 = vld [vmem:[#allocation3 + $0x18] sm:$0xff] (%p178_p6)  ;;  %s223_s8 = sshll.u32 (%p178_p6), %s702_s22, 4  ;;  %s224_s8 = int_to_ptr.vmem [resolvable:$true] %s223_s8 }
 0x217   :  { %v201_v23 = vmul.f32 (%p178_p6), %v195_v22, %v194_v20  ;;  %v197_v24 = vld [vmem:[#allocation4 + $0x18] sm:$0xff] (%p178_p6)  ;;  %v196_v29 = vld [vmem:[#allocation4 + $0x10] sm:$0xff] (%p178_p6)  ;;  %s235_s1 = sshll.u32 (%p178_p6), %s703_s12, 4  ;;  %s598_s24 = scalar_lea.vmem (%p178_p6), %s224_s8, 256  ;;  %s934_s1 = int_to_ptr.vmem [resolvable:$true] %s235_s1 }
 0x218   :  { %199 = vadd.xlane.f32.xlu0 (%p178_p6), %v198_v21  ;;  %p599_p7 = scmp.ne.s32.totalorder (%p178_p6), %s224_s8, %s598_s24  ;;  %p603_p8 = scmp.lt.s32.totalorder (%p178_p6), %s224_s8, %s224_s8 }
 0x219   :  { %p604_p9 = scmp.lt.s32.totalorder (%p178_p6), %s598_s24, %s598_s24 }
 0x21b   :  { %p605_p10 = por (%p178_p6), %p604_p9, %p603_p8 }
 0x21c   :  { %202 = vadd.xlane.f32.xlu0 (%p178_p6), %v201_v23 }
 0x21d   :  { %p606_p11 = pnand %p605_p10, %p599_p7 }
 0x2a5   :  { %v200_v25 = vpop.xlane.xlu0 %199 }
 0x2a6   :  { %v204_v26 = vmul.f32 %v200_v25, %v197_v24 }
 0x2a8   :  { %v205_v27 = vadd.f32 %v204_v26, %v192_v18 }
 0x2a9   :  { %v203_v28 = vpop.xlane.xlu0 %202 }
 0x2aa   :  { %214 = vst [vmem:[#allocation10 + $0x8] sm:$0xff] %v205_v27  ;;  %v206_v30 = vmul.f32 %v203_v28, %v197_v24  ;;  %v208_v32 = vadd.f32 %v205_v27, %v196_v29 }
 0x2ac   :  { %v207_v31 = vadd.f32 %v206_v30, %v194_v20 }
 0x2ae   :  { %v209_v33 = vsub.f32 %v208_v32, %v207_v31  ;;  %215 = vst [vmem:[#allocation12 + $0x8] sm:$0xff] %v207_v31 }
 0x2b0   :  { %v210_v34 = vand.u32 2147483647, %v209_v33 }
 0x2b2   :  { %211 = vadd.xlane.f32.xlu1 %v210_v34 }
 0x2b3   :  { %609 = shalt.err (!%p606_p11)
}
 0x2b4   :  { %s610_s17 = scalar_lea.hbm %s973_s6, 256 }
 0x2b5   :  { %p611_p12 = scmp.ne.s32.totalorder %s973_s6, %s610_s17  ;;  %p614_p13 = scmp.lt.u32.totalorder %s610_s17, %s973_s6 }
 0x2b7   :  { %p616_p0 = pnand %p614_p13, %p611_p12 }
 0x2b9   :  { %619 = shalt.err (!%p616_p0)
}
 0x2ba   :  { %s704_s20 = smov 128   ;;  %s705_s26 = smov 8  }
 0x2bb   :  { %229 = dma.vmem_to_hbm [thread:$0]  %s224_s8, 256, %s973_s6, [#allocation11], %s704_s20, %s704_s20, %s705_s26  }
 0x2bc   :  { %s620_s18 = scalar_lea.vmem %s934_s1, 256  ;;  %p625_p2 = scmp.lt.s32.totalorder %s934_s1, %s934_s1 }
 0x2bd   :  { %p621_p1 = scmp.ne.s32.totalorder %s934_s1, %s620_s18  ;;  %p626_p3 = scmp.lt.s32.totalorder %s620_s18, %s620_s18 }
 0x2bf   :  { %p627_p4 = por %p626_p3, %p625_p2 }
 0x2c1   :  { %p628_p5 = pnand %p627_p4, %p621_p1 }
 0x2c3   :  { %631 = shalt.err (!%p628_p5)
}
 0x2c4   :  { %s632_s0 = scalar_lea.hbm %s974_s7, 256 }
 0x2c5   :  { %p633_p6 = scmp.ne.s32.totalorder %s974_s7, %s632_s0  ;;  %p636_p7 = scmp.lt.u32.totalorder %s632_s0, %s974_s7 }
 0x2c7   :  { %p638_p8 = pnand %p636_p7, %p633_p6 }
 0x2c9   :  { %641 = shalt.err (!%p638_p8)
}
 0x2ca   :  { %241 = dma.vmem_to_hbm [thread:$0]  %s934_s1, 256, %s974_s7, [#allocation13], %s704_s20, %s704_s20, %s705_s26  }
 0x33f   :  { %v212_v35 = vpop.xlane.xlu1 %211 }
 0x340   :  { %213 = vst.msk [vmem:[%s972_s5 + $0x8] sm:$0xff] %vm172_vm0, %v212_v35 }
 0x341   :  { %672 = dma.done.wait [#allocation11], 256  }
 0x342   :  { %673 = vsyncadd [#allocation11], 4294967040 }
 0x343   :  { %674 = dma.done.wait [#allocation13], 256  }
 0x344   :  { %675 = vsyncadd [#allocation13], 4294967040 }
 0x345   :  { %250 = vsyncpa [#allocation11], 1 }
 0x346   :  { %251 = vsyncpa [#allocation13], 1 }
 0x347   :  { %252 = vsyncmov [#allocation5] }
 0x34a   :  { %s253_s15 = vpop.sfrf %252 }
 0x34b   :  { %p369_p9 = scmp.ne.s32.totalorder %s253_s15, 0 }
 0x34d   :  { %257 = shalt.err (%p369_p9)  }
 0x34e   :  { %259 = vsyncmov [#allocation5 + $0x1] }
 0x351   :  { %s260_s22 = vpop.sfrf %259 }
 0x352   :  { %p370_p10 = scmp.ne.s32.totalorder %s260_s22, 0 }
 0x354   :  { %264 = shalt.err (%p370_p10)  }
 0x355   :  { %266 = vsyncmov [#allocation5 + $0x2] }
 0x358   :  { %s267_s7 = vpop.sfrf %266 }
 0x359   :  { %p371_p11 = scmp.ne.s32.totalorder %s267_s7, 0 }
 0x35b   :  { %271 = shalt.err (%p371_p11)  }
 0x35c   :  { %273 = vsyncmov [#allocation5 + $0x3] }
 0x35f   :  { %s274_s5 = vpop.sfrf %273 }
 0x360   :  { %p372_p12 = scmp.ne.s32.totalorder %s274_s5, 0 }
 0x362   :  { %278 = shalt.err (%p372_p12)  }
 0x363   :  { %280 = vsyncmov [#allocation5 + $0x4] }
 0x366   :  { %s281_s8 = vpop.sfrf %280 }
 0x367   :  { %p373_p13 = scmp.ne.s32.totalorder %s281_s8, 0 }
 0x369   :  { %285 = shalt.err (%p373_p13)  }
 0x36a   :  { %287 = vsyncmov [#allocation5 + $0x5] }
 0x36d   :  { %s288_s12 = vpop.sfrf %287 }
 0x36e   :  { %p374_p0 = scmp.ne.s32.totalorder %s288_s12, 0 }
 0x370   :  { %292 = shalt.err (%p374_p0)  }

</bundles_post_ra>
